<compile_context>
chip_gen: v7x
topology: tpu7x:2x2x1
jax: 0.10.0
libtpu: 0.0.40
codegen_flags: <defaults>
</compile_context>

<pallas_src>
import jax
import jax.numpy as jnp
from jax.experimental import pallas as pl
from jax.experimental.pallas import tpu as pltpu

HIDDEN = 768          # hardcoded hidden_size in MultiTaskNet.__init__
TILE_M_MAX = 2048     # row-tile cap: 2048*768*4B (f32) x2 double-buffer ~= 12.6 MB
LANE = 128            # output lane width


def _round_up(x, m):
    return ((x + m - 1) // m) * m


def _tagging_head_kernel(enc_ref, w_ref, b_ref, logits_ref):
    """One row-tile of fc(enc) for the tagging task head.

    enc_ref:    [TILE_M, H]      f32  VMEM  (activation tile, cast to bf16 here)
    w_ref:      [H, V_PAD]       bf16 VMEM  (transposed, zero-padded weight, resident)
    b_ref:      [1, V_PAD]       f32  VMEM  (zero-padded bias, resident)
    logits_ref: [TILE_M, V_PAD]  f32        (lane-dense output)
    """
    x_bf16 = enc_ref[...].astype(jnp.bfloat16)          # in-kernel cast (VPU)
    acc = jnp.dot(x_bf16, w_ref[...], preferred_element_type=jnp.float32)
    logits_ref[...] = acc + b_ref[...]


def tagging_forward(enc, y, fc_weight, fc_bias):
    """Pallas equivalent of MultiTaskNet.forward for a 'tagging' task (eval).

    enc:       [B, S, 768]  float32  (BERT last_hidden_state stand-in)
    y:         [B, S]       int32    (labels, passed through)
    fc_weight: [V, 768]     float32  (PyTorch nn.Linear weight layout)
    fc_bias:   [V]          float32
    returns (logits [B,S,V] f32, y, y_hat [B,S] i32)
    """
    B, S, H = enc.shape
    assert H == HIDDEN
    V = fc_weight.shape[0]
    BS = B * S

    # Lane-dense padded vocab dim (keep at 128: HBM-bound, wider only costs writes).
    V_PAD = max(LANE, _round_up(V, LANE))

    # Row tile: multiple of 16, capped at TILE_M_MAX, and at most ~BS/2 so large
    # problems get >= 2 grid steps (feeds both v7x TensorCores via "parallel").
    half = _round_up((BS + 1) // 2, 16)
    TILE_M = max(16, min(TILE_M_MAX, half))
    grid_m = pl.cdiv(BS, TILE_M)          # ragged last block handled by Pallas

    # enc stays f32 (no wrapper cast / pad — reshape of leading dims is free).
    enc2 = enc.reshape(BS, H)
    # Weight/bias prep is tiny (768 x 128): transpose, pad, cast once.
    w = jnp.pad(jnp.transpose(fc_weight), ((0, 0), (0, V_PAD - V))).astype(jnp.bfloat16)
    b = jnp.pad(fc_bias, (0, V_PAD - V)).reshape(1, V_PAD).astype(jnp.float32)

    bytes_accessed = (BS * H * 4          # enc (f32, read once by the kernel)
                      + H * V_PAD * 2     # weight (bf16)
                      + V_PAD * 4         # bias
                      + BS * V_PAD * 4)   # logits out (f32)

    logits_pad = pl.pallas_call(
        _tagging_head_kernel,
        grid=(grid_m,),
        out_shape=jax.ShapeDtypeStruct((BS, V_PAD), jnp.float32),
        in_specs=[
            pl.BlockSpec((TILE_M, H), lambda i: (i, 0)),     # streamed row tiles
            pl.BlockSpec((H, V_PAD), lambda i: (0, 0)),      # weight resident
            pl.BlockSpec((1, V_PAD), lambda i: (0, 0)),      # bias resident
        ],
        out_specs=pl.BlockSpec((TILE_M, V_PAD), lambda i: (i, 0)),
        compiler_params=pltpu.CompilerParams(
            dimension_semantics=("parallel",),               # megacore sharding
            vmem_limit_bytes=32 * 1024 * 1024,
        ),
        cost_estimate=pl.CostEstimate(
            flops=2 * BS * H * V_PAD,
            transcendentals=0,
            bytes_accessed=bytes_accessed,
        ),
    )(enc2, w, b)

    # Caller needs the dense f32 logits (module return value); argmax fuses on it.
    logits = logits_pad[:, :V].reshape(B, S, V)
    y_hat = jnp.argmax(logits, axis=-1).astype(jnp.int32)
    return logits, y, y_hat


if __name__ == "__main__":
    key = jax.random.PRNGKey(0)
    B, S = 2, 8

    # Tagging vocab containing both 'O' and '<PAD>' -> vocab_size = len(vocab)
    vocab = ['<PAD>', 'O', 'B-LOC', 'I-LOC', 'B-PER', 'I-PER',
             'B-ORG', 'I-ORG', 'B-MISC', 'I-MISC', 'B-DATE', 'I-DATE']
    V = len(vocab)

    k_enc, k_y, k_w, k_b = jax.random.split(key, 4)

    # Deterministic stand-in for BERT's sequence output (x_enc bypass).
    enc = jax.random.normal(k_enc, (B, S, HIDDEN), dtype=jnp.float32)
    y = jax.random.randint(k_y, (B, S), 0, V, dtype=jnp.int32)

    # Deterministic nn.Linear(768, V)-style init: U(-1/sqrt(H), 1/sqrt(H)).
    bound = 1.0 / (HIDDEN ** 0.5)
    fc_weight = jax.random.uniform(k_w, (V, HIDDEN), jnp.float32, -bound, bound)
    fc_bias = jax.random.uniform(k_b, (V,), jnp.float32, -bound, bound)

    logits, y_out, y_hat = jax.jit(tagging_forward)(enc, y, fc_weight, fc_bias)
    jax.block_until_ready((logits, y_out, y_hat))

    # Pure-JAX reference using the same bf16-cast operands (f32 accumulation),
    # matching the kernel's in-body bf16 cast + MXU f32 accumulation.
    enc_bf = enc.reshape(B * S, HIDDEN).astype(jnp.bfloat16).astype(jnp.float32)
    w_bf = fc_weight.T.astype(jnp.bfloat16).astype(jnp.float32)
    ref_logits = (enc_bf @ w_bf + fc_bias).reshape(B, S, V)
    ref_yhat = jnp.argmax(ref_logits, axis=-1).astype(jnp.int32)

    # Also sanity-check against the full-f32 reference with a looser tolerance.
    ref_logits_f32 = (enc.reshape(B * S, HIDDEN) @ fc_weight.T + fc_bias).reshape(B, S, V)

    assert jnp.allclose(logits, ref_logits, atol=1e-3, rtol=1e-3)
    assert jnp.allclose(logits, ref_logits_f32, atol=5e-2, rtol=5e-2)
    assert jnp.array_equal(y_hat, ref_yhat)
    assert jnp.array_equal(y_out, y)

    print("KERNEL_OK")
</pallas_src>

<mosaic_0001>
module attributes {stable_mosaic.version = 11 : i64} {
  func.func @_tagging_head_kernel(%arg0: i32, %arg1: memref<16x768xf32, #tpu.memory_space<vmem>>, %arg2: memref<768x128xbf16, #tpu.memory_space<vmem>>, %arg3: memref<1x128xf32, #tpu.memory_space<vmem>>, %arg4: memref<16x128xf32, #tpu.memory_space<vmem>>) attributes {dimension_semantics = [#tpu.dimension_semantics<parallel>], iteration_bounds = array<i64: 1>, scalar_prefetch = 0 : i64, scratch_operands = 0 : i64, tpu.core_type = #tpu.core_type<tc>, window_params = [{transform_indices = @transform_0, window_bounds = array<i64: 16, 768>}, {pipeline_mode = #tpu.pipeline_mode<synchronous>, transform_indices = @transform_1, window_bounds = array<i64: 768, 128>}, {pipeline_mode = #tpu.pipeline_mode<synchronous>, transform_indices = @transform_2, window_bounds = array<i64: 1, 128>}, {transform_indices = @transform_3, window_bounds = array<i64: 16, 128>}]} {
    %c0 = arith.constant 0 : index
    %c0_0 = arith.constant 0 : index
    %0 = vector.load %arg1[%c0, %c0_0] : memref<16x768xf32, #tpu.memory_space<vmem>>, vector<16x768xf32>
    %1 = arith.truncf %0 : vector<16x768xf32> to vector<16x768xbf16>
    %c0_1 = arith.constant 0 : index
    %c0_2 = arith.constant 0 : index
    %2 = vector.load %arg2[%c0_1, %c0_2] : memref<768x128xbf16, #tpu.memory_space<vmem>>, vector<768x128xbf16>
    %cst = arith.constant dense<0.000000e+00> : vector<16x128xf32>
    %3 = tpu.matmul %1, %2, %cst {dimension_numbers = #tpu.dot_dimension_numbers<[1], [0], [0], [1], [0, 0, 1, 1], [], []>} : vector<16x768xbf16>, vector<768x128xbf16>, vector<16x128xf32> -> vector<16x128xf32>
    %c0_3 = arith.constant 0 : index
    %c0_4 = arith.constant 0 : index
    %4 = vector.load %arg3[%c0_3, %c0_4] : memref<1x128xf32, #tpu.memory_space<vmem>>, vector<1x128xf32>
    %5 = vector.broadcast %4 : vector<1x128xf32> to vector<16x128xf32>
    %6 = arith.addf %3, %5 : vector<16x128xf32>
    %c0_5 = arith.constant 0 : index
    %c0_6 = arith.constant 0 : index
    %7 = vector.load %arg4[%c0_5, %c0_6] : memref<16x128xf32, #tpu.memory_space<vmem>>, vector<16x128xf32>
    tpu.vector_store %arg4[%c0_5, %c0_6], %6 {strides = array<i32>} : memref<16x128xf32, #tpu.memory_space<vmem>>, vector<16x128xf32>,
    return
  }
  func.func @transform_0(%arg0: i32) -> (i32, i32) {
    %c0_i32 = arith.constant 0 : i32
    %c0_i32_0 = arith.constant 0 : i32
    return %arg0, %c0_i32 : i32, i32
  }
  func.func @transform_1(%arg0: i32) -> (i32, i32) {
    %c0_i32 = arith.constant 0 : i32
    %c0_i32_0 = arith.constant 0 : i32
    %c0_i32_1 = arith.constant 0 : i32
    return %c0_i32, %c0_i32_0 : i32, i32
  }
  func.func @transform_2(%arg0: i32) -> (i32, i32) {
    %c0_i32 = arith.constant 0 : i32
    %c0_i32_0 = arith.constant 0 : i32
    %c0_i32_1 = arith.constant 0 : i32
    return %c0_i32, %c0_i32_0 : i32, i32
  }
  func.func @transform_3(%arg0: i32) -> (i32, i32) {
    %c0_i32 = arith.constant 0 : i32
    %c0_i32_0 = arith.constant 0 : i32
    return %arg0, %c0_i32 : i32, i32
  }
}

</mosaic_0001>

<bundles_post_ra>
// kernel: tagging_forward.1
= control target key start
LH: loop header
LB: loop body
LE: loop exit
PB: predicated region body
PF: predicated region fallthrough
CT: control target
= control target key end

     0   :  { %s925_s1 = inlined_call_operand.vmem [shape: bf16[768,128], index: 1, kind: input, shape index: {}]   ;;  %s926_s0 = inlined_call_operand.vmem [shape: f32[16,768], index: 0, kind: input, shape index: {}]   ;;  %s927_s2 = inlined_call_operand.vmem [shape: f32[1,128], index: 2, kind: input, shape index: {}]   ;;  %s928_s3 = inlined_call_operand.vmem [shape: f32[16,128], index: 3, kind: output, shape index: {}]  }
   0x1   :  { %v668_v0 = vld [vmem:[%s925_s1 + $0x40] sm:$0xff]   ;;  %v672_v4 = vld [vmem:[%s925_s1 + $0x48] sm:$0xff]   ;;  %v676_v8 = vld [vmem:[%s925_s1 + $0x50] sm:$0xff]  }
   0x2   :  { %v669_v1 = vld [vmem:[%s925_s1] sm:$0xff]   ;;  %602 = vmatprep.subr.bf16.mxu0 %v668_v0  ;;  %v673_v5 = vld [vmem:[%s925_s1 + $0x8] sm:$0xff]   ;;  %v677_v9 = vld [vmem:[%s925_s1 + $0x10] sm:$0xff]  }
   0x3   :  { %v670_v2 = vld [vmem:[%s925_s1 + $0xc0] sm:$0xff]   ;;  %603 = vmatpush3.bf16.msra.mxu0 %v669_v1  ;;  %v674_v6 = vld [vmem:[%s925_s1 + $0xc8] sm:$0xff]   ;;  %v678_v10 = vld [vmem:[%s925_s1 + $0xd0] sm:$0xff]  }
   0x4   :  { %v671_v3 = vld [vmem:[%s925_s1 + $0x80] sm:$0xff]   ;;  %624 = vmatprep.subr.bf16.mxu1 %v670_v2  ;;  %604 = vmatprep.subr.bf16.mxu0 %v672_v4  ;;  %v675_v7 = vld [vmem:[%s925_s1 + $0x88] sm:$0xff]   ;;  %v679_v11 = vld [vmem:[%s925_s1 + $0x90] sm:$0xff]  }
   0x5   :  { %625 = vmatpush3.bf16.msra.mxu1 %v671_v3  ;;  %v680_v12 = vld [vmem:[%s925_s1 + $0x58] sm:$0xff]   ;;  %v684_v16 = vld [vmem:[%s925_s1 + $0x60] sm:$0xff]   ;;  %v688_v20 = vld [vmem:[%s925_s1 + $0x68] sm:$0xff]  }
   0x6   :  { %626 = vmatprep.subr.bf16.mxu1 %v674_v6  ;;  %v681_v13 = vld [vmem:[%s925_s1 + $0x18] sm:$0xff]   ;;  %v685_v17 = vld [vmem:[%s925_s1 + $0x20] sm:$0xff]   ;;  %v689_v21 = vld [vmem:[%s925_s1 + $0x28] sm:$0xff]  }
   0x7   :  { %605 = vmatpush3.bf16.msra.mxu0 %v673_v5  ;;  %v682_v14 = vld [vmem:[%s925_s1 + $0xd8] sm:$0xff]   ;;  %v686_v18 = vld [vmem:[%s925_s1 + $0xe0] sm:$0xff]   ;;  %v690_v22 = vld [vmem:[%s925_s1 + $0xe8] sm:$0xff]  }
   0x8   :  { %606 = vmatprep.subr.bf16.mxu0 %v676_v8  ;;  %v683_v15 = vld [vmem:[%s925_s1 + $0x98] sm:$0xff]   ;;  %v687_v19 = vld [vmem:[%s925_s1 + $0xa0] sm:$0xff]   ;;  %v691_v23 = vld [vmem:[%s925_s1 + $0xa8] sm:$0xff]  }
   0x9   :  { %627 = vmatpush3.bf16.msra.mxu1 %v675_v7  ;;  %v692_v24 = vld [vmem:[%s925_s1 + $0x70] sm:$0xff]   ;;  %v696_v28 = vld [vmem:[%s925_s1 + $0x78] sm:$0xff]   ;;  %v16_v31 = vld [vmem:[%s926_s0 + $0x8] sm:$0xff] }
   0xa   :  { %628 = vmatprep.subr.bf16.mxu1 %v678_v10  ;;  %v693_v25 = vld [vmem:[%s925_s1 + $0x30] sm:$0xff]   ;;  %v697_v29 = vld [vmem:[%s925_s1 + $0x38] sm:$0xff]   ;;  %v15_v35 = vld [vmem:[%s926_s0] sm:$0xff] }
   0xb   :  { %607 = vmatpush3.bf16.msra.mxu0 %v677_v9  ;;  %v694_v26 = vld [vmem:[%s925_s1 + $0xf0] sm:$0xff]   ;;  %v698_v30 = vld [vmem:[%s925_s1 + $0xf8] sm:$0xff]   ;;  %v700_v38 = vld [vmem:[%s925_s1 + $0x140] sm:$0xff]  }
   0xc   :  { %608 = vmatprep.subr.bf16.mxu0 %v680_v12  ;;  %v695_v27 = vld [vmem:[%s925_s1 + $0xb0] sm:$0xff]   ;;  %v22_v32 = vld [vmem:[%s926_s0 + $0x38] sm:$0xff]  ;;  %v24_v40 = vld [vmem:[%s926_s0 + $0x48] sm:$0xff] }
   0xd   :  { %629 = vmatpush3.bf16.msra.mxu1 %v679_v11  ;;  %v28_v33 = vpack.c.bf16 %v22_v32, %v16_v31  ;;  %v699_v34 = vld [vmem:[%s925_s1 + $0xb8] sm:$0xff]   ;;  %v21_v36 = vld [vmem:[%s926_s0 + $0x30] sm:$0xff]  ;;  %v701_v42 = vld [vmem:[%s925_s1 + $0x100] sm:$0xff]  }
   0xe   :  { %630 = vmatprep.subr.bf16.mxu1 %v682_v14  ;;  %v27_v37 = vpack.c.bf16 %v21_v36, %v15_v35  ;;  %v18_v39 = vld [vmem:[%s926_s0 + $0x18] sm:$0xff]  ;;  %v17_v43 = vld [vmem:[%s926_s0 + $0x10] sm:$0xff]  ;;  %v23_v44 = vld [vmem:[%s926_s0 + $0x40] sm:$0xff] }
   0xf   :  { %609 = vmatpush3.bf16.msra.mxu0 %v681_v13  ;;  %456 = vmatprep.mubr.bf16.mxu0 %v28_v33  ;;  %v30_v41 = vpack.c.bf16 %v24_v40, %v18_v39  ;;  %v29_v45 = vpack.c.bf16 %v23_v44, %v17_v43  ;;  %v702_v46 = vld [vmem:[%s925_s1 + $0x148] sm:$0xff]   ;;  %v704_v48 = vld [vmem:[%s925_s1 + $0x150] sm:$0xff]   ;;  %v706_v50 = vld [vmem:[%s925_s1 + $0x158] sm:$0xff]  }
  0x10   :  { %610 = vmatprep.subr.bf16.mxu0 %v684_v16  ;;  %v703_v47 = vld [vmem:[%s925_s1 + $0x108] sm:$0xff]   ;;  %v705_v49 = vld [vmem:[%s925_s1 + $0x110] sm:$0xff]   ;;  %v707_v51 = vld [vmem:[%s925_s1 + $0x118] sm:$0xff]  }
  0x11   :  { %631 = vmatpush3.bf16.msra.mxu1 %v683_v15  ;;  %497 = vmatprep.mubr.bf16.mxu1 %v30_v41  ;;  %v708_v52 = vld [vmem:[%s925_s1 + $0x160] sm:$0xff]   ;;  %v710_v54 = vld [vmem:[%s925_s1 + $0x168] sm:$0xff]   ;;  %v26_v56 = vld [vmem:[%s926_s0 + $0x58] sm:$0xff] }
  0x12   :  { %632 = vmatprep.subr.bf16.mxu1 %v686_v18  ;;  %v709_v53 = vld [vmem:[%s925_s1 + $0x120] sm:$0xff]   ;;  %v20_v55 = vld [vmem:[%s926_s0 + $0x28] sm:$0xff]  ;;  %v712_v59 = vld [vmem:[%s925_s1 + $0x170] sm:$0xff]  }
  0x13   :  { %611 = vmatpush3.bf16.msra.mxu0 %v685_v17  ;;  %v32_v57 = vpack.c.bf16 %v26_v56, %v20_v55  ;;  %v711_v58 = vld [vmem:[%s925_s1 + $0x128] sm:$0xff]   ;;  %v713_v60 = vld [vmem:[%s925_s1 + $0x130] sm:$0xff]   ;;  %v714_v61 = vld [vmem:[%s925_s1 + $0x178] sm:$0xff]  }
  0x14   :  { %612 = vmatprep.subr.bf16.mxu0 %v688_v20  ;;  %v715_v62 = vld [vmem:[%s925_s1 + $0x138] sm:$0xff]   ;;  %v19_v63 = vld [vmem:[%s926_s0 + $0x20] sm:$0xff]  ;;  %v25_v0 = vld [vmem:[%s926_s0 + $0x50] sm:$0xff] }
  0x15   :  { %633 = vmatpush3.bf16.msra.mxu1 %v687_v19  ;;  %v31_v1 = vpack.c.bf16 %v25_v0, %v19_v63  ;;  %v553_v3 = vld [vmem:[%s927_s2] ss:$0 sm:$0xff] }
  0x16   :  { %634 = vmatprep.subr.bf16.mxu1 %v690_v22 }
  0x17   :  { %613 = vmatpush3.bf16.msra.mxu0 %v689_v21 }
  0x18   :  { %614 = vmatprep.subr.bf16.mxu0 %v692_v24 }
  0x19   :  { %635 = vmatpush3.bf16.msra.mxu1 %v691_v23 }
  0x1a   :  { %636 = vmatprep.subr.bf16.mxu1 %v694_v26 }
  0x1b   :  { %615 = vmatpush3.bf16.msra.mxu0 %v693_v25 }
  0x1c   :  { %616 = vmatprep.subr.bf16.mxu0 %v696_v28 }
  0x1d   :  { %637 = vmatpush3.bf16.msra.mxu1 %v695_v27 }
  0x1e   :  { %638 = vmatprep.subr.bf16.mxu1 %v698_v30 }
  0x1f   :  { %617 = vmatpush3.bf16.msra.mxu0 %v697_v29 }
  0x20   :  { %646 = vmatprep.subr.bf16.mxu0 %v700_v38 }
  0x21   :  { %639 = vmatpush3.bf16.msra.mxu1 %v699_v34 }
  0x22   :  { %457 = vmatmul.mubr.bf16.vlgmr.msra.gmra.mrb[0].mxu0 %v27_v37 }
  0x23   :  { %647 = vmatpush3.bf16.msra.mxu0 %v701_v42  ;;  %538 = vmatprep.mubr.bf16.mxu0 %v32_v57 }
  0x24   :  { %498 = vmatmul.mubr.bf16.vlgmr.msra.gmra.mrb[0].mxu1 %v29_v45  ;;  %648 = vmatprep.subr.bf16.mxu0 %v702_v46 }
  0x27   :  { %649 = vmatpush3.bf16.msra.mxu0 %v703_v47 }
  0x28   :  { %650 = vmatprep.subr.bf16.mxu0 %v704_v48 }
  0x2b   :  { %651 = vmatpush3.bf16.msra.mxu0 %v705_v49 }
  0x2c   :  { %652 = vmatprep.subr.bf16.mxu0 %v706_v50 }
  0x2f   :  { %653 = vmatpush3.bf16.msra.mxu0 %v707_v51 }
  0x30   :  { %654 = vmatprep.subr.bf16.mxu0 %v708_v52 }
  0x33   :  { %655 = vmatpush3.bf16.msra.mxu0 %v709_v53 }
  0x34   :  { %656 = vmatprep.subr.bf16.mxu0 %v710_v54 }
  0x37   :  { %657 = vmatpush3.bf16.msra.mxu0 %v711_v58 }
  0x38   :  { %658 = vmatprep.subr.bf16.mxu0 %v712_v59 }
  0x3b   :  { %659 = vmatpush3.bf16.msra.mxu0 %v713_v60 }
  0x3c   :  { %660 = vmatprep.subr.bf16.mxu0 %v714_v61 }
  0x3f   :  { %661 = vmatpush3.bf16.msra.mxu0 %v715_v62 }
  0x42   :  { %539 = vmatmul.mubr.bf16.vlgmr.msra.gmra.mrb[4].mxu0 %v31_v1 }
  0xf5   :  { %v618_v2 = vpop.f32.mrb[0].mxu0 }
  0xf6   :  { %v619_v4 = vpop.f32.mrb[1].mxu0 }
  0xf7   :  { %v620_v5 = vadd.f32 %v619_v4, %v618_v2  ;;  %v621_v6 = vpop.f32.mrb[2].mxu0  ;;  %v640_v7 = vpop.f32.mrb[0].mxu1 }
  0xf8   :  { %v622_v8 = vpop.f32.mrb[3].mxu0  ;;  %v641_v11 = vpop.f32.mrb[1].mxu1 }
  0xf9   :  { %v459_v9 = vadd.f32 %v620_v5, %v553_v3  ;;  %v623_v10 = vadd.f32 %v622_v8, %v621_v6  ;;  %v642_v12 = vadd.f32 %v641_v11, %v640_v7  ;;  %v643_v13 = vpop.f32.mrb[2].mxu1 }
  0xfa   :  { %v644_v15 = vpop.f32.mrb[3].mxu1 }
  0xfb   :  { %v462_v14 = vadd.f32 %v623_v10, %v553_v3  ;;  %v500_v16 = vadd.f32 %v642_v12, %v459_v9  ;;  %v645_v17 = vadd.f32 %v644_v15, %v643_v13 }
  0xfd   :  { %v503_v18 = vadd.f32 %v645_v17, %v462_v14 }
 0x115   :  { %v662_v19 = vpop.f32.mrb[4].mxu0 }
 0x116   :  { %v663_v20 = vpop.f32.mrb[5].mxu0 }
 0x117   :  { %v664_v21 = vadd.f32 %v663_v20, %v662_v19  ;;  %v665_v22 = vpop.f32.mrb[6].mxu0 }
 0x118   :  { %v666_v23 = vpop.f32.mrb[7].mxu0 }
 0x119   :  { %v541_v24 = vadd.f32 %v664_v21, %v500_v16  ;;  %v667_v25 = vadd.f32 %v666_v23, %v665_v22 }
 0x11b   :  { %547 = vst [vmem:[%s928_s3] sm:$0xff] %v541_v24  ;;  %v544_v26 = vadd.f32 %v667_v25, %v503_v18 }
 0x11d   :  { %548 = vst [vmem:[%s928_s3 + $0x8] sm:$0xff] %v544_v26 }

</bundles_post_ra>
